<compile_context>
chip_gen: v7x
topology: tpu7x:2x2x1
jax: 0.10.0
libtpu: 0.0.40
codegen_flags: <defaults>
</compile_context>

<pallas_src>
import functools

import numpy as np
import jax
import jax.numpy as jnp
from jax.experimental import pallas as pl
from jax.experimental.pallas import tpu as pltpu

ATOM_FDIM = 24
BOND_FDIM = 32
HIDDEN = 32
DEPTH = 3


def _round_up(x, m):
    return (x + m - 1) // m * m


def _vmem_limit(nbytes):
    # generous headroom over the resident footprint, capped below v7x physical VMEM
    return int(min(64 << 20, max(4 << 20, 2 * int(nbytes))))


# ----------------------------------------------------------------------------
# Pallas kernels
# ----------------------------------------------------------------------------
def mpn_init_kernel(f_bonds_ref, wi_ref, inp_ref, msg_ref):
    """inp = W_i(f_bonds); message_0 = relu(inp) (stored bf16 for the MXU)."""
    inp = jnp.dot(f_bonds_ref[...], wi_ref[...], preferred_element_type=jnp.float32)
    inp_ref[...] = inp
    msg_ref[...] = jnp.maximum(inp, 0.0).astype(msg_ref.dtype)


def mpn_step_kernel(m_ref, msg_ref, inp_ref, wh_ref, out_ref):
    """One directed-bond (D-MPNN) message passing step for a block of bond rows.

    m_ref is a bf16 (tb, n_bonds_pad) row block of the fused propagation matrix,
    so  M @ message == a_message[b2a] - w_bonds * message[b2revb]  exactly.
    """
    agg = jnp.dot(m_ref[...], msg_ref[...], preferred_element_type=jnp.float32)
    upd = jnp.dot(agg, wh_ref[...], preferred_element_type=jnp.float32)
    out_ref[...] = jnp.maximum(inp_ref[...] + upd, 0.0).astype(out_ref.dtype)


def mpn_readout_kernel(aw_ref, msg_ref, f_atoms_ref, wo_a_ref, wo_m_ref, bo_ref,
                       r_ref, out_ref):
    """Atom readout + weighted-mean molecule readout.

    W_o(cat([f_atoms, a_message])) is split into two matmuls (no lane concat).
    r_ref already carries degree_of_polym * w_atoms / sum(w_atoms) so the whole
    molecule readout is one matmul (no in-kernel divide).
    """
    a_msg = jnp.dot(aw_ref[...], msg_ref[...], preferred_element_type=jnp.float32)
    ah = (jnp.dot(f_atoms_ref[...], wo_a_ref[...], preferred_element_type=jnp.float32)
          + jnp.dot(a_msg, wo_m_ref[...], preferred_element_type=jnp.float32)
          + bo_ref[...])
    atom_hiddens = jnp.maximum(ah, 0.0)
    out_ref[...] = jnp.dot(r_ref[...], atom_hiddens,
                           preferred_element_type=jnp.float32)


# ----------------------------------------------------------------------------
# pallas_call wrappers
# ----------------------------------------------------------------------------
def _init_call(f_bonds, wi, tb):
    nbp, bond_fdim = f_bonds.shape
    hidden = wi.shape[1]
    vmem = _vmem_limit(2 * tb * bond_fdim * 4 + bond_fdim * hidden * 4
                       + 4 * tb * hidden * 4 + (1 << 20))
    return pl.pallas_call(
        mpn_init_kernel,
        grid=(nbp // tb,),
        in_specs=[pl.BlockSpec((tb, bond_fdim), lambda i: (i, 0)),
                  pl.BlockSpec((bond_fdim, hidden), lambda i: (0, 0))],
        out_specs=[pl.BlockSpec((tb, hidden), lambda i: (i, 0)),
                   pl.BlockSpec((tb, hidden), lambda i: (i, 0))],
        out_shape=[jax.ShapeDtypeStruct((nbp, hidden), jnp.float32),
                   jax.ShapeDtypeStruct((nbp, hidden), jnp.bfloat16)],
        compiler_params=pltpu.CompilerParams(
            dimension_semantics=("parallel",), vmem_limit_bytes=vmem),
    )(f_bonds, wi)


def _step_call(m_prop, msg, inp, wh, tb):
    nbp = m_prop.shape[0]
    hidden = wh.shape[1]
    # M row-blocks are streamed from HBM with the default double-buffered
    # BlockSpec pipeline (use pipeline_mode=pl.Buffered(3) if DMA ever exposes);
    # the full message stays VMEM-resident (constant index_map).
    vmem = _vmem_limit(2 * tb * nbp * 2            # M row blocks (bf16, double buf)
                       + nbp * hidden * 2          # resident message (bf16)
                       + 2 * tb * hidden * 4       # inp blocks
                       + hidden * hidden * 4       # W_h
                       + 2 * tb * hidden * 2       # out blocks (bf16)
                       + (2 << 20))
    return pl.pallas_call(
        mpn_step_kernel,
        grid=(nbp // tb,),
        in_specs=[pl.BlockSpec((tb, nbp), lambda i: (i, 0)),
                  pl.BlockSpec((nbp, hidden), lambda i: (0, 0)),
                  pl.BlockSpec((tb, hidden), lambda i: (i, 0)),
                  pl.BlockSpec((hidden, hidden), lambda i: (0, 0))],
        out_specs=pl.BlockSpec((tb, hidden), lambda i: (i, 0)),
        out_shape=jax.ShapeDtypeStruct((nbp, hidden), jnp.bfloat16),
        compiler_params=pltpu.CompilerParams(
            dimension_semantics=("parallel",), vmem_limit_bytes=vmem),
    )(m_prop, msg, inp, wh)


def _readout_call(aw, msg, f_atoms, wo_a, wo_m, bo, r_scaled):
    nap = aw.shape[0]
    hidden = wo_m.shape[1]
    nmp = r_scaled.shape[0]
    vmem = _vmem_limit(aw.size * 2 + msg.size * 2 + f_atoms.size * 4
                       + (wo_a.size + wo_m.size + bo.size + r_scaled.size) * 4
                       + (nap + nmp) * hidden * 4 + (2 << 20))
    vspec = pl.BlockSpec(memory_space=pltpu.MemorySpace.VMEM)
    return pl.pallas_call(
        mpn_readout_kernel,
        in_specs=[vspec] * 7,
        out_specs=vspec,
        out_shape=jax.ShapeDtypeStruct((nmp, hidden), jnp.float32),
        compiler_params=pltpu.CompilerParams(vmem_limit_bytes=vmem),
    )(aw, msg, f_atoms, wo_a, wo_m, bo, r_scaled)


@functools.partial(jax.jit, static_argnames=("depth", "tb"))
def _mpn_device(m_prop, aw, r_scaled, f_atoms_p, f_bonds_p,
                wi, wh, wo_a, wo_m, bo, *, depth, tb):
    inp, msg = _init_call(f_bonds_p, wi, tb)
    for _ in range(depth - 1):                 # dropout p=0.0 -> identity
        msg = _step_call(m_prop, msg, inp, wh, tb)
    return _readout_call(aw, msg, f_atoms_p, wo_a, wo_m, bo, r_scaled)


# ----------------------------------------------------------------------------
# Host glue: build the fused dense graph operators (padded, bf16 where large).
# ----------------------------------------------------------------------------
def _prepare_dense(f_atoms, f_bonds, w_atoms, w_bonds, a2b, b2a, b2revb,
                   a_scope, degree_of_polym):
    f_atoms_np = np.asarray(f_atoms, np.float32)
    f_bonds_np = np.asarray(f_bonds, np.float32)
    w_atoms_np = np.asarray(w_atoms, np.float32)
    w_bonds_np = np.asarray(w_bonds, np.float32)
    a2b_np = np.asarray(a2b)
    b2a_np = np.asarray(b2a)
    b2revb_np = np.asarray(b2revb)
    dop_np = np.asarray(degree_of_polym, np.float32)

    n_atoms, atom_fdim = f_atoms_np.shape
    n_bonds, bond_fdim = f_bonds_np.shape
    n_mols = len(a_scope)

    # chemprop convention: index 0 is the zero-padding bond/atom.
    assert float(w_bonds_np[0]) == 0.0, "padding bond (index 0) must have weight 0"

    # Padded sizes: multiples of 8; 128/256-row bond tiles for large graphs.
    if n_bonds >= 512:
        tb = 256
    elif n_bonds >= 128:
        tb = 128
    else:
        tb = _round_up(n_bonds, 8)
    nbp = _round_up(n_bonds, tb)
    nap = _round_up(n_atoms, 8)
    nmp = _round_up(n_mols, 8)

    # Weighted incidence: AW[a, b] = w_bonds[b] if bond b is incoming to atom a.
    aw = np.zeros((nap, nbp), np.float32)
    for a in range(n_atoms):
        for b in a2b_np[a]:
            b = int(b)
            if b != 0:                         # 0 = padding bond
                aw[a, b] += w_bonds_np[b]

    # Fused bond->bond propagation matrix:
    #   (M @ message)[b] = a_message[b2a[b]] - w_bonds[b] * message[b2revb[b]]
    m_prop = np.zeros((nbp, nbp), np.float32)
    m_prop[:n_bonds] = aw[b2a_np]
    m_prop[np.arange(n_bonds), b2revb_np] -= w_bonds_np

    # Molecule readout (aggregation='mean') with degree_of_polym and
    # 1/sum(w_atoms) folded in.  Guard sum==0 (the PyTorch reference would NaN).
    r_scaled = np.zeros((nmp, nap), np.float32)
    for i, (a_start, a_size) in enumerate(a_scope):
        w = w_atoms_np[a_start:a_start + a_size]
        sw = float(w.sum())
        scale = float(dop_np[i]) / sw if sw > 0.0 else 0.0
        r_scaled[i, a_start:a_start + a_size] = scale * w

    f_atoms_p = np.zeros((nap, atom_fdim), np.float32)
    f_atoms_p[:n_atoms] = f_atoms_np
    f_bonds_p = np.zeros((nbp, bond_fdim), np.float32)
    f_bonds_p[:n_bonds] = f_bonds_np

    return dict(
        m_prop=jnp.asarray(m_prop, jnp.bfloat16),   # big operands in bf16
        aw=jnp.asarray(aw, jnp.bfloat16),
        r_scaled=jnp.asarray(r_scaled, jnp.float32),
        f_atoms=jnp.asarray(f_atoms_p, jnp.float32),
        f_bonds=jnp.asarray(f_bonds_p, jnp.float32),
        tb=int(tb), n_mols=int(n_mols), atom_fdim=int(atom_fdim),
    )


def mpn_forward(f_atoms, f_bonds, w_atoms, w_bonds, a2b, b2a, b2revb, a_scope,
                degree_of_polym, params, depth=DEPTH):
    # TODO(synk): for production, skip this dense host glue entirely -- ship
    # a2b/b2a/b2revb as int32 arrays via PrefetchScalarGridSpec scalar prefetch
    # (SMEM) and express the gathers with data-dependent index_maps, or cache
    # the fused M across calls when the graph is static.
    prep = _prepare_dense(f_atoms, f_bonds, w_atoms, w_bonds, a2b, b2a, b2revb,
                          a_scope, degree_of_polym)
    afd = prep["atom_fdim"]
    wo = params["W_o"]
    out = _mpn_device(prep["m_prop"], prep["aw"], prep["r_scaled"],
                      prep["f_atoms"], prep["f_bonds"],
                      params["W_i"], params["W_h"],
                      wo[:afd], wo[afd:], params["b_o"][None, :],
                      depth=depth, tb=prep["tb"])
    # MPN wrapper: number_of_molecules == 1, features_only/use_input_features
    # False -> reduce(concat, encodings) is just the single encoding.
    return out[:prep["n_mols"]]


# ----------------------------------------------------------------------------
# Pure-JAX f32 reference (gather formulation, mirrors the PyTorch code 1:1).
# ----------------------------------------------------------------------------
def mpn_reference(f_atoms, f_bonds, w_atoms, w_bonds, a2b, b2a, b2revb, a_scope,
                  degree_of_polym, params, depth=DEPTH):
    hp = jax.lax.Precision.HIGHEST
    Wi, Wh, Wo, bo = params["W_i"], params["W_h"], params["W_o"], params["b_o"]
    inp = jnp.dot(f_bonds, Wi, precision=hp)
    message = jnp.maximum(inp, 0.0)
    for _ in range(depth - 1):
        nei_msg = message[a2b] * w_bonds[a2b][..., None]
        a_message = nei_msg.sum(axis=1)
        rev_message = message[b2revb]
        msg = a_message[b2a] - rev_message * w_bonds[:, None]
        message = jnp.maximum(inp + jnp.dot(msg, Wh, precision=hp), 0.0)
    nei_msg = message[a2b] * w_bonds[a2b][..., None]
    a_message = nei_msg.sum(axis=1)
    a_input = jnp.concatenate([f_atoms, a_message], axis=1)
    atom_hiddens = jnp.maximum(jnp.dot(a_input, Wo, precision=hp) + bo, 0.0)
    mol_vecs = []
    for i, (a_start, a_size) in enumerate(a_scope):
        cur = atom_hiddens[a_start:a_start + a_size]
        w = w_atoms[a_start:a_start + a_size]
        mv = (w[:, None] * cur).sum(axis=0) / w.sum()
        mol_vecs.append(degree_of_polym[i] * mv)
    return jnp.stack(mol_vecs, axis=0)


# ----------------------------------------------------------------------------
# Synthetic BatchMolGraph-style data (chemprop conventions: index 0 = padding).
# ----------------------------------------------------------------------------
def build_synthetic_graph():
    # molecule 1: 4-atom chain; molecule 2: 3-atom ring (local atom indices)
    mols = [(4, [(0, 1), (1, 2), (2, 3)]),
            (3, [(0, 1), (1, 2), (2, 0)])]
    n_atoms, n_bonds = 1, 1                   # index 0 is the zero-padding entry
    a_scope = []
    a2b_lists = [[]]
    b2a = [0]
    b2revb = [0]
    for na, edges in mols:
        a_start = n_atoms
        a_scope.append((a_start, na))
        a2b_lists.extend([[] for _ in range(na)])
        for (u, v) in edges:
            gu, gv = a_start + u, a_start + v
            b1, b2 = n_bonds, n_bonds + 1     # two directed bonds per edge
            b2a.append(gu); a2b_lists[gv].append(b1)   # gu -> gv (incoming to gv)
            b2a.append(gv); a2b_lists[gu].append(b2)   # gv -> gu (incoming to gu)
            b2revb.extend([b2, b1])
            n_bonds += 2
        n_atoms += na
    max_nb = max(len(lst) for lst in a2b_lists)
    a2b = np.zeros((n_atoms, max_nb), np.int32)
    for a, lst in enumerate(a2b_lists):
        a2b[a, :len(lst)] = lst
    return (n_atoms, n_bonds, a2b, np.asarray(b2a, np.int32),
            np.asarray(b2revb, np.int32), a_scope)


if __name__ == "__main__":
    n_atoms, n_bonds, a2b, b2a, b2revb, a_scope = build_synthetic_graph()
    n_mols = len(a_scope)

    key = jax.random.PRNGKey(0)
    ks = jax.random.split(key, 8)
    f_atoms = jax.random.normal(ks[0], (n_atoms, ATOM_FDIM), jnp.float32).at[0].set(0.0)
    f_bonds = jax.random.normal(ks[1], (n_bonds, BOND_FDIM), jnp.float32).at[0].set(0.0)
    w_atoms = jax.random.uniform(ks[2], (n_atoms,), jnp.float32, 0.5, 1.0).at[0].set(0.0)
    w_bonds = jax.random.uniform(ks[3], (n_bonds,), jnp.float32, 0.5, 1.0).at[0].set(0.0)
    degree_of_polym = jnp.ones((n_mols,), jnp.float32)

    # Deterministic parameter init (shapes from MPNEncoder.__init__, bias=False
    # for W_i / W_h, bias for W_o; stored pre-transposed as (in, out)).
    params = {
        "W_i": jax.random.normal(ks[4], (BOND_FDIM, HIDDEN), jnp.float32) / jnp.sqrt(float(BOND_FDIM)),
        "W_h": 0.5 * jax.random.normal(ks[5], (HIDDEN, HIDDEN), jnp.float32) / jnp.sqrt(float(HIDDEN)),
        "W_o": jax.random.normal(ks[6], (ATOM_FDIM + HIDDEN, HIDDEN), jnp.float32) / jnp.sqrt(float(ATOM_FDIM + HIDDEN)),
        "b_o": 0.01 * jax.random.normal(ks[7], (HIDDEN,), jnp.float32),
    }

    out = mpn_forward(f_atoms, f_bonds, w_atoms, w_bonds, a2b, b2a, b2revb,
                      a_scope, degree_of_polym, params, depth=DEPTH)
    out = jax.block_until_ready(out)

    ref = jax.block_until_ready(
        mpn_reference(f_atoms, f_bonds, w_atoms, w_bonds, jnp.asarray(a2b),
                      jnp.asarray(b2a), jnp.asarray(b2revb), a_scope,
                      degree_of_polym, params, depth=DEPTH))

    # The big graph matmuls (M @ msg, AW @ msg) run in bf16 with f32 accumulation
    # per the perf review, so validate at a bf16-appropriate tolerance against
    # the exact-f32 PyTorch-faithful reference.
    np.testing.assert_allclose(np.asarray(out), np.asarray(ref), rtol=5e-2, atol=5e-2)
    assert out.shape == (n_mols, HIDDEN)
    print("KERNEL_OK")
</pallas_src>

<mosaic_0001>
module attributes {stable_mosaic.version = 11 : i64} {
  func.func @mpn_init_kernel(%arg0: i32, %arg1: memref<16x32xf32, #tpu.memory_space<vmem>>, %arg2: memref<32x32xf32, #tpu.memory_space<vmem>>, %arg3: memref<16x32xf32, #tpu.memory_space<vmem>>, %arg4: memref<16x32xbf16, #tpu.memory_space<vmem>>) attributes {dimension_semantics = [#tpu.dimension_semantics<parallel>], iteration_bounds = array<i64: 1>, scalar_prefetch = 0 : i64, scratch_operands = 0 : i64, tpu.core_type = #tpu.core_type<tc>, window_params = [{transform_indices = @transform_0, window_bounds = array<i64: 16, 32>}, {pipeline_mode = #tpu.pipeline_mode<synchronous>, transform_indices = @transform_1, window_bounds = array<i64: 32, 32>}, {transform_indices = @transform_2, window_bounds = array<i64: 16, 32>}, {transform_indices = @transform_3, window_bounds = array<i64: 16, 32>}]} {
    %c0 = arith.constant 0 : index
    %c0_0 = arith.constant 0 : index
    %0 = vector.load %arg1[%c0, %c0_0] : memref<16x32xf32, #tpu.memory_space<vmem>>, vector<16x32xf32>
    %c0_1 = arith.constant 0 : index
    %c0_2 = arith.constant 0 : index
    %1 = vector.load %arg2[%c0_1, %c0_2] : memref<32x32xf32, #tpu.memory_space<vmem>>, vector<32x32xf32>
    %cst = arith.constant dense<0.000000e+00> : vector<16x32xf32>
    %2 = tpu.matmul %0, %1, %cst {dimension_numbers = #tpu.dot_dimension_numbers<[1], [0], [0], [1], [0, 0, 1, 1], [], []>} : vector<16x32xf32>, vector<32x32xf32>, vector<16x32xf32> -> vector<16x32xf32>
    %c0_3 = arith.constant 0 : index
    %c0_4 = arith.constant 0 : index
    %3 = vector.load %arg3[%c0_3, %c0_4] : memref<16x32xf32, #tpu.memory_space<vmem>>, vector<16x32xf32>
    tpu.vector_store %arg3[%c0_3, %c0_4], %2 {strides = array<i32>} : memref<16x32xf32, #tpu.memory_space<vmem>>, vector<16x32xf32>,
    %cst_5 = arith.constant 0.000000e+00 : f32
    %4 = vector.broadcast %cst_5 : f32 to vector<16x32xf32>
    %5 = arith.maximumf %2, %4 : vector<16x32xf32>
    %6 = arith.truncf %5 : vector<16x32xf32> to vector<16x32xbf16>
    %c0_6 = arith.constant 0 : index
    %c0_7 = arith.constant 0 : index
    %7 = vector.load %arg4[%c0_6, %c0_7] : memref<16x32xbf16, #tpu.memory_space<vmem>>, vector<16x32xbf16>
    tpu.vector_store %arg4[%c0_6, %c0_7], %6 {strides = array<i32>} : memref<16x32xbf16, #tpu.memory_space<vmem>>, vector<16x32xbf16>,
    return
  }
  func.func @transform_0(%arg0: i32) -> (i32, i32) {
    %c0_i32 = arith.constant 0 : i32
    %c0_i32_0 = arith.constant 0 : i32
    return %arg0, %c0_i32 : i32, i32
  }
  func.func @transform_1(%arg0: i32) -> (i32, i32) {
    %c0_i32 = arith.constant 0 : i32
    %c0_i32_0 = arith.constant 0 : i32
    %c0_i32_1 = arith.constant 0 : i32
    return %c0_i32, %c0_i32_0 : i32, i32
  }
  func.func @transform_2(%arg0: i32) -> (i32, i32) {
    %c0_i32 = arith.constant 0 : i32
    %c0_i32_0 = arith.constant 0 : i32
    return %arg0, %c0_i32 : i32, i32
  }
  func.func @transform_3(%arg0: i32) -> (i32, i32) {
    %c0_i32 = arith.constant 0 : i32
    %c0_i32_0 = arith.constant 0 : i32
    return %arg0, %c0_i32 : i32, i32
  }
}

module attributes {stable_mosaic.version = 11 : i64} {
  func.func @mpn_readout_kernel(%arg0: memref<8x16xbf16, #tpu.memory_space<vmem>>, %arg1: memref<16x32xbf16, #tpu.memory_space<vmem>>, %arg2: memref<8x24xf32, #tpu.memory_space<vmem>>, %arg3: memref<24x32xf32, #tpu.memory_space<vmem>>, %arg4: memref<32x32xf32, #tpu.memory_space<vmem>>, %arg5: memref<1x32xf32, #tpu.memory_space<vmem>>, %arg6: memref<8x8xf32, #tpu.memory_space<vmem>>, %arg7: memref<8x32xf32, #tpu.memory_space<vmem>>) attributes {dimension_semantics = [], scalar_prefetch = 0 : i64, scratch_operands = 0 : i64, tpu.core_type = #tpu.core_type<tc>} {
    %c0 = arith.constant 0 : index
    %c0_0 = arith.constant 0 : index
    %0 = vector.load %arg0[%c0, %c0_0] : memref<8x16xbf16, #tpu.memory_space<vmem>>, vector<8x16xbf16>
    %c0_1 = arith.constant 0 : index
    %c0_2 = arith.constant 0 : index
    %1 = vector.load %arg1[%c0_1, %c0_2] : memref<16x32xbf16, #tpu.memory_space<vmem>>, vector<16x32xbf16>
    %cst = arith.constant dense<0.000000e+00> : vector<8x32xf32>
    %2 = tpu.matmul %0, %1, %cst {dimension_numbers = #tpu.dot_dimension_numbers<[1], [0], [0], [1], [0, 0, 1, 1], [], []>} : vector<8x16xbf16>, vector<16x32xbf16>, vector<8x32xf32> -> vector<8x32xf32>
    %c0_3 = arith.constant 0 : index
    %c0_4 = arith.constant 0 : index
    %3 = vector.load %arg2[%c0_3, %c0_4] : memref<8x24xf32, #tpu.memory_space<vmem>>, vector<8x24xf32>
    %c0_5 = arith.constant 0 : index
    %c0_6 = arith.constant 0 : index
    %4 = vector.load %arg3[%c0_5, %c0_6] : memref<24x32xf32, #tpu.memory_space<vmem>>, vector<24x32xf32>
    %cst_7 = arith.constant dense<0.000000e+00> : vector<8x32xf32>
    %5 = tpu.matmul %3, %4, %cst_7 {dimension_numbers = #tpu.dot_dimension_numbers<[1], [0], [0], [1], [0, 0, 1, 1], [], []>} : vector<8x24xf32>, vector<24x32xf32>, vector<8x32xf32> -> vector<8x32xf32>
    %c0_8 = arith.constant 0 : index
    %c0_9 = arith.constant 0 : index
    %6 = vector.load %arg4[%c0_8, %c0_9] : memref<32x32xf32, #tpu.memory_space<vmem>>, vector<32x32xf32>
    %cst_10 = arith.constant dense<0.000000e+00> : vector<8x32xf32>
    %7 = tpu.matmul %2, %6, %cst_10 {dimension_numbers = #tpu.dot_dimension_numbers<[1], [0], [0], [1], [0, 0, 1, 1], [], []>} : vector<8x32xf32>, vector<32x32xf32>, vector<8x32xf32> -> vector<8x32xf32>
    %8 = arith.addf %5, %7 : vector<8x32xf32>
    %c0_11 = arith.constant 0 : index
    %c0_12 = arith.constant 0 : index
    %9 = vector.load %arg5[%c0_11, %c0_12] : memref<1x32xf32, #tpu.memory_space<vmem>>, vector<1x32xf32>
    %10 = vector.broadcast %9 : vector<1x32xf32> to vector<8x32xf32>
    %11 = arith.addf %8, %10 : vector<8x32xf32>
    %cst_13 = arith.constant 0.000000e+00 : f32
    %12 = vector.broadcast %cst_13 : f32 to vector<8x32xf32>
    %13 = arith.maximumf %11, %12 : vector<8x32xf32>
    %c0_14 = arith.constant 0 : index
    %c0_15 = arith.constant 0 : index
    %14 = vector.load %arg6[%c0_14, %c0_15] : memref<8x8xf32, #tpu.memory_space<vmem>>, vector<8x8xf32>
    %cst_16 = arith.constant dense<0.000000e+00> : vector<8x32xf32>
    %15 = tpu.matmul %14, %13, %cst_16 {dimension_numbers = #tpu.dot_dimension_numbers<[1], [0], [0], [1], [0, 0, 1, 1], [], []>} : vector<8x8xf32>, vector<8x32xf32>, vector<8x32xf32> -> vector<8x32xf32>
    %c0_17 = arith.constant 0 : index
    %c0_18 = arith.constant 0 : index
    %16 = vector.load %arg7[%c0_17, %c0_18] : memref<8x32xf32, #tpu.memory_space<vmem>>, vector<8x32xf32>
    tpu.vector_store %arg7[%c0_17, %c0_18], %15 {strides = array<i32>} : memref<8x32xf32, #tpu.memory_space<vmem>>, vector<8x32xf32>,
    return
  }
}

module attributes {stable_mosaic.version = 11 : i64} {
  func.func @mpn_step_kernel(%arg0: i32, %arg1: memref<16x16xbf16, #tpu.memory_space<vmem>>, %arg2: memref<16x32xbf16, #tpu.memory_space<vmem>>, %arg3: memref<16x32xf32, #tpu.memory_space<vmem>>, %arg4: memref<32x32xf32, #tpu.memory_space<vmem>>, %arg5: memref<16x32xbf16, #tpu.memory_space<vmem>>) attributes {dimension_semantics = [#tpu.dimension_semantics<parallel>], iteration_bounds = array<i64: 1>, scalar_prefetch = 0 : i64, scratch_operands = 0 : i64, tpu.core_type = #tpu.core_type<tc>, window_params = [{transform_indices = @transform_0, window_bounds = array<i64: 16, 16>}, {pipeline_mode = #tpu.pipeline_mode<synchronous>, transform_indices = @transform_1, window_bounds = array<i64: 16, 32>}, {transform_indices = @transform_2, window_bounds = array<i64: 16, 32>}, {pipeline_mode = #tpu.pipeline_mode<synchronous>, transform_indices = @transform_3, window_bounds = array<i64: 32, 32>}, {transform_indices = @transform_4, window_bounds = array<i64: 16, 32>}]} {
    %c0 = arith.constant 0 : index
    %c0_0 = arith.constant 0 : index
    %0 = vector.load %arg1[%c0, %c0_0] : memref<16x16xbf16, #tpu.memory_space<vmem>>, vector<16x16xbf16>
    %c0_1 = arith.constant 0 : index
    %c0_2 = arith.constant 0 : index
    %1 = vector.load %arg2[%c0_1, %c0_2] : memref<16x32xbf16, #tpu.memory_space<vmem>>, vector<16x32xbf16>
    %cst = arith.constant dense<0.000000e+00> : vector<16x32xf32>
    %2 = tpu.matmul %0, %1, %cst {dimension_numbers = #tpu.dot_dimension_numbers<[1], [0], [0], [1], [0, 0, 1, 1], [], []>} : vector<16x16xbf16>, vector<16x32xbf16>, vector<16x32xf32> -> vector<16x32xf32>
    %c0_3 = arith.constant 0 : index
    %c0_4 = arith.constant 0 : index
    %3 = vector.load %arg4[%c0_3, %c0_4] : memref<32x32xf32, #tpu.memory_space<vmem>>, vector<32x32xf32>
    %cst_5 = arith.constant dense<0.000000e+00> : vector<16x32xf32>
    %4 = tpu.matmul %2, %3, %cst_5 {dimension_numbers = #tpu.dot_dimension_numbers<[1], [0], [0], [1], [0, 0, 1, 1], [], []>} : vector<16x32xf32>, vector<32x32xf32>, vector<16x32xf32> -> vector<16x32xf32>
    %c0_6 = arith.constant 0 : index
    %c0_7 = arith.constant 0 : index
    %5 = vector.load %arg3[%c0_6, %c0_7] : memref<16x32xf32, #tpu.memory_space<vmem>>, vector<16x32xf32>
    %6 = arith.addf %5, %4 : vector<16x32xf32>
    %cst_8 = arith.constant 0.000000e+00 : f32
    %7 = vector.broadcast %cst_8 : f32 to vector<16x32xf32>
    %8 = arith.maximumf %6, %7 : vector<16x32xf32>
    %9 = arith.truncf %8 : vector<16x32xf32> to vector<16x32xbf16>
    %c0_9 = arith.constant 0 : index
    %c0_10 = arith.constant 0 : index
    %10 = vector.load %arg5[%c0_9, %c0_10] : memref<16x32xbf16, #tpu.memory_space<vmem>>, vector<16x32xbf16>
    tpu.vector_store %arg5[%c0_9, %c0_10], %9 {strides = array<i32>} : memref<16x32xbf16, #tpu.memory_space<vmem>>, vector<16x32xbf16>,
    return
  }
  func.func @transform_0(%arg0: i32) -> (i32, i32) {
    %c0_i32 = arith.constant 0 : i32
    %c0_i32_0 = arith.constant 0 : i32
    return %arg0, %c0_i32 : i32, i32
  }
  func.func @transform_1(%arg0: i32) -> (i32, i32) {
    %c0_i32 = arith.constant 0 : i32
    %c0_i32_0 = arith.constant 0 : i32
    %c0_i32_1 = arith.constant 0 : i32
    return %c0_i32, %c0_i32_0 : i32, i32
  }
  func.func @transform_2(%arg0: i32) -> (i32, i32) {
    %c0_i32 = arith.constant 0 : i32
    %c0_i32_0 = arith.constant 0 : i32
    return %arg0, %c0_i32 : i32, i32
  }
  func.func @transform_3(%arg0: i32) -> (i32, i32) {
    %c0_i32 = arith.constant 0 : i32
    %c0_i32_0 = arith.constant 0 : i32
    %c0_i32_1 = arith.constant 0 : i32
    return %c0_i32, %c0_i32_0 : i32, i32
  }
  func.func @transform_4(%arg0: i32) -> (i32, i32) {
    %c0_i32 = arith.constant 0 : i32
    %c0_i32_0 = arith.constant 0 : i32
    return %arg0, %c0_i32 : i32, i32
  }
}

</mosaic_0001>

<bundles_post_ra>
// kernel: _mpn_device.5
= control target key start
LH: loop header
LB: loop body
LE: loop exit
PB: predicated region body
PF: predicated region fallthrough
CT: control target
= control target key end

     0   :  { %v231_v0 = vmov 0.0   ;;  %vm232_vm0 = vmmov 0   ;;  %vm33_vm1 = vcmask 130048   ;;  %vm82_vm2 = vcmask 261120   ;;  %s288_s1 = inlined_call_operand.vmem [shape: bf16[16,32], index: 1, kind: input, shape index: {}]   ;;  %s289_s0 = inlined_call_operand.vmem [shape: bf16[16,16], index: 0, kind: input, shape index: {}]   ;;  %s290_s3 = inlined_call_operand.vmem [shape: f32[32,32], index: 3, kind: input, shape index: {}]   ;;  %s291_s2 = inlined_call_operand.vmem [shape: f32[16,32], index: 2, kind: input, shape index: {}]   ;;  %s292_s4 = inlined_call_operand.vmem [shape: bf16[16,32], index: 4, kind: output, shape index: {}]  }
   0x1   :  { %202 = vmatprep.subr.bf16.mxu0 %v231_v0  ;;  %v229_v1 = vld [vmem:[%s288_s1] sm:$0xff]   ;;  %204 = vmatprep.mubr.msk.bf16.mxu0 %vm232_vm0, %v231_v0  ;;  %v79_v4 = vld [vmem:[%s290_s3 + $0x8] sm:$0xff]  ;;  %v80_v5 = vld [vmem:[%s290_s3 + $0x10] sm:$0xff]  ;;  %vm178_vm3 = vcmask 257024  }
   0x2   :  { %v230_v2 = vld [vmem:[%s289_s0] sm:$0xff]   ;;  %203 = vmatpush3.bf16.msra.mxu0 %v229_v1  ;;  %v81_v7 = vld [vmem:[%s290_s3 + $0x18] sm:$0xff]  ;;  %v165_v13 = vld [vmem:[%s291_s2 + $0x8] sm:$0xff] }
   0x3   :  { %v78_v3 = vld [vmem:[%s290_s3] sm:$0xff]  ;;  %v223_v8 = vpack.c.bf16 %v81_v7, %v80_v5 }
   0x4   :  { %v219_v6 = vpack.c.bf16 %v79_v4, %v78_v3  ;;  %v164_v14 = vld [vmem:[%s291_s2] sm:$0xff] }
   0x5   :  { %205 = vmatmul.mubr.msk.bf16.vlgmr.msra.gmra.mrb[0].mxu0 %vm33_vm1, %v230_v2 }
   0x6   :  { %220 = vmatprep.subr.bf16.mxu1 %v219_v6 }
   0x7   :  { %222 = vmatpush3.bf16.msra.mxu1 %v219_v6 }
   0x8   :  { %224 = vmatprep.subr.bf16.mxu1 %v223_v8 }
   0xb   :  { %226 = vmatpush3.bf16.msra.mxu1 %v223_v8 }
  0xd8   :  { %v71_v9 = vpop.f32.mrb[0].mxu0 }
  0xd9   :  { %v206_v10 = vpop.f32.mrb[1].mxu0  ;;  %216 = vmatprep.mubr.msk.f32.mxu1 %vm82_vm2, %v71_v9 }
  0xda   :  { %v74_v11 = vpop.f32.mrb[2].mxu0 }
  0xdb   :  { %v207_v12 = vpop.f32.mrb[3].mxu0  ;;  %217 = vmatmul.mubr.msk.f32.vlgmr.msra.gmra.mrb[0].mxu1 %vm82_vm2, %v74_v11 }
 0x1ae   :  { %v218_v15 = vpop.f32.mrb[0].mxu1 }
 0x1af   :  { %v167_v16 = vadd.f32 %v218_v15, %v165_v13  ;;  %v155_v17 = vpop.f32.mrb[1].mxu1 }
 0x1b0   :  { %v166_v18 = vadd.f32 %v164_v14, %v155_v17 }
 0x1b1   :  { %v169_v19 = vmax.f32 %v167_v16, 0.0 }
 0x1b2   :  { %v168_v20 = vmax.f32 %v166_v18, 0.0 }
 0x1b3   :  { %v193_v21 = vpack.c.bf16 %v169_v19, %v169_v19 }
 0x1b4   :  { %v192_v22 = vpack.c.bf16 %v168_v20, %v168_v20 }
 0x1b5   :  { %180 = vst.msk [vmem:[%s292_s4 + $0x4] sm:$0xf] %vm178_vm3, %v193_v21 }
 0x1b6   :  { %179 = vst.msk [vmem:[%s292_s4] sm:$0xf] %vm178_vm3, %v192_v22 }

// kernel: _mpn_device.7
= control target key start
LH: loop header
LB: loop body
LE: loop exit
PB: predicated region body
PF: predicated region fallthrough
CT: control target
= control target key end

     0   :  { %v424_v1 = vmov 0.0   ;;  %vm425_vm0 = vmmov 0   ;;  %vm37_vm1 = vcmask 130048   ;;  %v426_v7 = vmov 0.0|0.0   ;;  %s522_s0 = inlined_call_operand.vmem [shape: bf16[8,16], index: 0, kind: input, shape index: {}]   ;;  %s523_s1 = inlined_call_operand.vmem [shape: bf16[16,32], index: 1, kind: input, shape index: {}]   ;;  %s524_s2 = inlined_call_operand.vmem [shape: f32[8,24], index: 2, kind: input, shape index: {}]   ;;  %s525_s3 = inlined_call_operand.vmem [shape: f32[24,32], index: 3, kind: input, shape index: {}]   ;;  %s526_s4 = inlined_call_operand.vmem [shape: f32[32,32], index: 4, kind: input, shape index: {}]   ;;  %s527_s5 = inlined_call_operand.vmem [shape: f32[1,32], index: 5, kind: input, shape index: {}]   ;;  %s528_s6 = inlined_call_operand.vmem [shape: f32[8,8], index: 6, kind: input, shape index: {}]   ;;  %s529_s7 = inlined_call_operand.hbm [shape: f32[8,32], index: 7, kind: output, shape index: {}]  }
   0x1   :  { %v399_v0 = vld [vmem:[%s523_s1] sm:$0xff]   ;;  %355 = vmatprep.subr.bf16.mxu0 %v424_v1  ;;  %357 = vmatprep.mubr.msk.bf16.mxu0 %vm425_vm0, %v424_v1  ;;  %v86_v4 = vld [vmem:[%s526_s4 + $0x8] sm:$0xff]  ;;  %v87_v10 = vld [vmem:[%s526_s4 + $0x10] sm:$0xff] }
   0x2   :  { %v28_v2 = vld [vmem:[%s522_s0] sm:$0xf]  ;;  %356 = vmatpush3.bf16.msra.mxu0 %v399_v0  ;;  %v83_v6 = vld [vmem:[%s525_s3 + $0x8] sm:$0xff]  ;;  %386 = vmatprep.subr.bf16.mxu1 %v426_v7  ;;  %v88_v11 = vld [vmem:[%s526_s4 + $0x18] sm:$0xff] }
   0x3   :  { %v85_v3 = vld [vmem:[%s526_s4] sm:$0xff]  ;;  %392 = vmatprep.subr.bf16.mxu0 %v426_v7  ;;  %369 = vmatprep.mubr.msk.f32.mxu1 %vm425_vm0, %v424_v1 }
   0x4   :  { %v82_v5 = vld [vmem:[%s525_s3] sm:$0xff]  ;;  %v387_v8 = vpack.c.bf16 %v86_v4, %v85_v3 }
   0x5   :  { %v393_v9 = vpack.c.bf16 %v83_v6, %v82_v5 }
   0x6   :  { %12 = vsyncpa [#allocation3], 0  ;;  %358 = vmatmul.mubr.msk.bf16.vlgmr.msra.gmra.mrb[0].mxu0 %vm37_vm1, %v28_v2  ;;  %388 = vmatpush3.bf16.msra.mxu1 %v387_v8  ;;  %v390_v12 = vpack.c.bf16 %v88_v11, %v87_v10  ;;  %v84_v13 = vld [vmem:[%s525_s3 + $0x10] sm:$0xff]  ;;  %v81_v14 = vld [vmem:[%s524_s2] sm:$0xff]  ;;  %vm163_vm2 = vcmask 195584   ;;  %vm89_vm3 = vcmask 261120  }
   0x7   :  { %394 = vmatpush3.bf16.msra.mxu0 %v393_v9  ;;  %389 = vmatprep.subr.bf16.mxu1 %v426_v7  ;;  %v340_v22 = vld [vmem:[%s527_s5] ss:$0 sm:$0xff]  ;;  %vm247_vm4 = vcmask 64512   ;;  %s427_s20 = smov [#allocation2]  }
   0x8   :  { %376 = vmatprep.subr.mxu0 %v424_v1  ;;  %378 = vmatprep.mubr.msk.f32.mxu0 %vm425_vm0, %v424_v1  ;;  %v246_v27 = vld [vmem:[%s528_s6] sm:$0xff]  ;;  %s328_s21 = sshll.u32 %s427_s20, 4  ;;  %s329_s21 = int_to_ptr.vmem [resolvable:$true] %s328_s21 }
   0x9   :  { %s400_s22 = scalar_lea.vmem %s329_s21, 128  ;;  %p405_p1 = scmp.lt.s32.totalorder %s329_s21, %s329_s21 }
   0xa   :  { %391 = vmatpush3.bf16.msra.mxu1 %v390_v12  ;;  %p401_p0 = scmp.ne.s32.totalorder %s329_s21, %s400_s22  ;;  %p406_p2 = scmp.lt.s32.totalorder %s400_s22, %s400_s22 }
   0xb   :  { %377 = vmatpush3.msra.mxu0 %v84_v13  ;;  %381 = vmatprep.subr.mxu1 %v424_v1 }
   0xc   :  { %p407_p3 = por %p406_p2, %p405_p1 }
   0xe   :  { %379 = vmatmul.mubr.msk.f32.vlgmr.msra.gmra.mrb[4].mxu0 %vm163_vm2, %v81_v14  ;;  %p408_p4 = pnand %p407_p3, %p401_p0 }
  0xd9   :  { %v75_v15 = vpop.f32.mrb[0].mxu0 }
  0xda   :  { %v359_v16 = vpop.f32.mrb[1].mxu0  ;;  %370 = vmatmul.mubr.msk.f32.vlgmr.msra.gmra.mrb[0].mxu1 %vm89_vm3, %v75_v15 }
  0xdb   :  { %v78_v17 = vpop.f32.mrb[2].mxu0  ;;  %383 = vmatprep.mubr.msk.f32.mxu1 %vm425_vm0, %v424_v1 }
  0xdc   :  { %v360_v18 = vpop.f32.mrb[3].mxu0 }
  0xe1   :  { %v233_v19 = vpop.f32.mrb[4].mxu0 }
  0xe2   :  { %v380_v20 = vpop.f32.mrb[5].mxu0 }
 0x1ad   :  { %v159_v21 = vpop.f32.mrb[0].mxu1 }
 0x1ae   :  { %v234_v23 = vadd.f32 %v233_v19, %v159_v21  ;;  %v371_v24 = vpop.f32.mrb[1].mxu1 }
 0x1b0   :  { %v244_v25 = vadd.f32 %v340_v22, %v234_v23 }
 0x1b2   :  { %v245_v26 = vmax.f32 %v244_v25, 0.0 }
 0x1b4   :  { %382 = vmatpush3.msra.mxu1 %v245_v26 }
 0x1b5   :  { %384 = vmatmul.mubr.msk.f32.vlgmr.msra.gmra.mrb[2].mxu1 %vm247_vm4, %v246_v27 }
 0x288   :  { %v317_v28 = vpop.f32.mrb[2].mxu1 }
 0x289   :  { %321 = vst.msk [vmem:[#allocation2] sm:$0xff] %vm89_vm3, %v317_v28  ;;  %v385_v29 = vpop.f32.mrb[3].mxu1 }
 0x28a   :  { %411 = shalt.err (!%p408_p4)
}
 0x28b   :  { %s412_s6 = scalar_lea.hbm %s529_s7, 128 }
 0x28c   :  { %p413_p5 = scmp.ne.s32.totalorder %s529_s7, %s412_s6  ;;  %p416_p6 = scmp.lt.u32.totalorder %s412_s6, %s529_s7 }
 0x28e   :  { %p418_p7 = pnand %p416_p6, %p413_p5 }
 0x290   :  { %421 = shalt.err (!%p418_p7)
}
 0x291   :  { %331 = dma.vmem_to_hbm [thread:$0]  %s329_s21, 128, %s529_s7, [#allocation3]  }
 0x292   :  { %422 = dma.done.wait [#allocation3], 128  }
 0x293   :  { %423 = vsyncadd [#allocation3], 4294967168 }
 0x294   :  { %335 = vsyncpa [#allocation3], 1 }

// kernel: _mpn_device.4
= control target key start
LH: loop header
LB: loop body
LE: loop exit
PB: predicated region body
PF: predicated region fallthrough
CT: control target
= control target key end

     0   :  { %9 = vsyncpa [#allocation3], 0  ;;  %s301_s0 = inlined_call_operand.hbm [shape: f32[16,32], index: 0, kind: input, shape index: {}]   ;;  %s302_s1 = inlined_call_operand.hbm [shape: f32[32,32], index: 1, kind: input, shape index: {}]   ;;  %s303_s2 = inlined_call_operand.vmem [shape: f32[16,32], index: 2, kind: output, shape index: {0}]   ;;  %s304_s3 = inlined_call_operand.vmem [shape: bf16[16,32], index: 3, kind: output, shape index: {1}]  }
   0x1   :  { %10 = vsyncpa [#allocation5], 0  ;;  %s237_s12 = smov [#allocation2]   ;;  %s189_s16 = scalar_lea.hbm %s301_s0, 256 }
   0x2   :  { %s16_s13 = sshll.u32 %s237_s12, 4  ;;  %p190_p0 = scmp.ne.s32.totalorder %s301_s0, %s189_s16  ;;  %s17_s13 = int_to_ptr.vmem [resolvable:$true] %s16_s13 }
   0x3   :  { %p193_p1 = scmp.lt.u32.totalorder %s189_s16, %s301_s0 }
   0x5   :  { %p195_p2 = pnand %p193_p1, %p190_p0 }
   0x7   :  { %198 = shalt.err (!%p195_p2)
}
   0x8   :  { %s199_s21 = scalar_lea.vmem %s17_s13, 256  ;;  %p204_p4 = scmp.lt.s32.totalorder %s17_s13, %s17_s13 }
   0x9   :  { %p200_p3 = scmp.ne.s32.totalorder %s17_s13, %s199_s21  ;;  %p205_p5 = scmp.lt.s32.totalorder %s199_s21, %s199_s21 }
   0xb   :  { %p206_p6 = por %p205_p5, %p204_p4 }
   0xd   :  { %p207_p7 = pnand %p206_p6, %p200_p3 }
   0xf   :  { %210 = shalt.err (!%p207_p7)
}
  0x10   :  { %s238_s22 = smov 128   ;;  %s239_s23 = smov 8  }
  0x11   :  { %22 = dma.hbm_to_vmem [thread:$0]  %s301_s0, 256, %s17_s13, [#allocation3], %s238_s22, %s238_s22, %s239_s23  }
  0x12   :  { %s240_s26 = smov [#allocation4]   ;;  %s211_s30 = scalar_lea.hbm %s302_s1, 512 }
  0x13   :  { %s28_s27 = sshll.u32 %s240_s26, 4  ;;  %p212_p8 = scmp.ne.s32.totalorder %s302_s1, %s211_s30  ;;  %s29_s27 = int_to_ptr.vmem [resolvable:$true] %s28_s27 }
  0x14   :  { %p215_p9 = scmp.lt.u32.totalorder %s211_s30, %s302_s1 }
  0x16   :  { %p217_p10 = pnand %p215_p9, %p212_p8 }
  0x18   :  { %220 = shalt.err (!%p217_p10)
}
  0x19   :  { %s221_s8 = scalar_lea.vmem %s29_s27, 512  ;;  %p226_p12 = scmp.lt.s32.totalorder %s29_s27, %s29_s27 }
  0x1a   :  { %p222_p11 = scmp.ne.s32.totalorder %s29_s27, %s221_s8  ;;  %p227_p13 = scmp.lt.s32.totalorder %s221_s8, %s221_s8 }
  0x1c   :  { %p228_p0 = por %p227_p13, %p226_p12 }
  0x1e   :  { %p229_p1 = pnand %p228_p0, %p222_p11 }
  0x20   :  { %232 = shalt.err (!%p229_p1)
}
  0x21   :  { %34 = dma.hbm_to_vmem [thread:$0]  %s302_s1, 512, %s29_s27, [#allocation5], %s238_s22, %s238_s22, %s239_s23  }
  0x22   :  { %233 = dma.done.wait [#allocation3], 256  }
  0x23   :  { %234 = vsyncadd [#allocation3], 4294967040 }
  0x24   :  { %235 = dma.done.wait [#allocation5], 512  }
  0x25   :  { %236 = vsyncadd [#allocation5], 4294966784  ;;  %vm47_vm0 = vcmask 261120   ;;  %v43_v0 = vld [vmem:[#allocation4] sm:$0xff]  ;;  %v44_v1 = vld [vmem:[#allocation4 + $0x8] sm:$0xff]  ;;  %vm141_vm1 = vcmask 257024  }
  0x26   :  { %v45_v2 = vld [vmem:[#allocation4 + $0x10] sm:$0xff]  ;;  %v177_v3 = vpack.c.bf16 %v44_v1, %v43_v0  ;;  %v46_v4 = vld [vmem:[#allocation4 + $0x18] sm:$0xff] }
  0x27   :  { %v41_v5 = vld [vmem:[#allocation2] sm:$0xff]  ;;  %v181_v6 = vpack.c.bf16 %v46_v4, %v45_v2  ;;  %v42_v7 = vld [vmem:[#allocation2 + $0x8] sm:$0xff] }
  0x28   :  { %174 = vmatprep.mubr.msk.f32.mxu0 %vm47_vm0, %v41_v5  ;;  %178 = vmatprep.subr.bf16.mxu0 %v177_v3 }
  0x29   :  { %180 = vmatpush3.bf16.msra.mxu0 %v177_v3 }
  0x2a   :  { %182 = vmatprep.subr.bf16.mxu0 %v181_v6 }
  0x2d   :  { %184 = vmatpush3.bf16.msra.mxu0 %v181_v6 }
  0x30   :  { %175 = vmatmul.mubr.msk.f32.vlgmr.msra.gmra.mrb[0].mxu0 %vm47_vm0, %v42_v7 }
 0x103   :  { %v176_v8 = vpop.f32.mrb[0].mxu0 }
 0x104   :  { %130 = vst.msk [vmem:[%s303_s2 + $0x8] sm:$0xff] %vm47_vm0, %v176_v8  ;;  %v132_v9 = vmax.f32 %v176_v8, 0.0  ;;  %v120_v10 = vpop.f32.mrb[1].mxu0 }
 0x105   :  { %129 = vst.msk [vmem:[%s303_s2] sm:$0xff] %vm47_vm0, %v120_v10  ;;  %v131_v11 = vmax.f32 %v120_v10, 0.0 }
 0x106   :  { %v159_v12 = vpack.c.bf16 %v132_v9, %v132_v9 }
 0x107   :  { %v158_v13 = vpack.c.bf16 %v131_v11, %v131_v11 }
 0x108   :  { %143 = vst.msk [vmem:[%s304_s3 + $0x4] sm:$0xf] %vm141_vm1, %v159_v12 }
 0x109   :  { %142 = vst.msk [vmem:[%s304_s3] sm:$0xf] %vm141_vm1, %v158_v13 }
 0x10a   :  { %152 = vsyncpa [#allocation3], 1 }
 0x10b   :  { %153 = vsyncpa [#allocation5], 1 }

</bundles_post_ra>
